<compile_context>
chip_gen: v7x
topology: tpu7x:2x2x1
jax: 0.10.0
libtpu: 0.0.40
codegen_flags: <defaults>
</compile_context>

<pallas_src>
import jax
import jax.numpy as jnp
from jax.experimental import pallas as pl
from jax.experimental.pallas import tpu as pltpu


def _nan_scrub_kernel(x_ref, o_ref):
    # x_ref / o_ref: [1, block_cols] lane-dense tiles of the last timestep.
    x = x_ref[...]
    o_ref[...] = jnp.where(jnp.isnan(x), jnp.zeros_like(x), x)


def _choose_cols_block(m, max_block):
    """Largest lane-dense (multiple-of-128) block that divides m, capped at
    max_block; fall back to the full row (always legal as a full-dim block)."""
    if m <= max_block or m % 128 != 0:
        return m
    b = max_block - (max_block % 128)
    while b >= 128:
        if m % b == 0:
            return b
        b -= 128
    return m


def mean_forward(x, pred_len, *, max_block_cols=32 * 1024):
    """x: [B, N, L] float -> out: [B, N, pred_len] (same dtype)."""
    B, N, L = x.shape
    M = B * N

    # Slice the last timestep *before* the kernel: only B*N values are
    # fetched, not the whole [B, N, L] slab.
    x_last = x[..., L - 1:L].reshape(1, M)            # [1, B*N], lanes = B*N

    bc = _choose_cols_block(M, max_block_cols)
    grid = (M // bc,)

    last_clean = pl.pallas_call(
        _nan_scrub_kernel,
        out_shape=jax.ShapeDtypeStruct((1, M), x.dtype),
        grid=grid,
        in_specs=[pl.BlockSpec((1, bc), lambda i: (0, i))],
        out_specs=pl.BlockSpec((1, bc), lambda i: (0, i)),
        compiler_params=pltpu.CompilerParams(
            dimension_semantics=("parallel",)),
    )(x_last)

    # TODO(synk): the original mutates x in place (x[isnan(x)] = 0); JAX is
    # functional, so only the values that reach the output are scrubbed.
    # The broadcast (torch .repeat) is left to XLA so it can fuse downstream.
    return jnp.broadcast_to(last_clean.reshape(B, N, 1), (B, N, pred_len))


if __name__ == "__main__":
    key = jax.random.PRNGKey(0)
    B, N, L = 2, 8, 16
    pred_len = 8  # MEAN.pred_len is set externally in the original codebase

    x = jax.random.normal(key, (B, N, L), dtype=jnp.float32)
    # inject NaNs to exercise the nan-to-zero path (one on the last timestep,
    # one elsewhere which must not affect the output)
    x = x.at[0, 0, -1].set(jnp.nan)
    x = x.at[1, 3, 5].set(jnp.nan)

    out = jax.block_until_ready(mean_forward(x, pred_len))

    # reference check in plain JAX (matches the PyTorch module)
    x_ref = jnp.nan_to_num(x, nan=0.0)
    ref = jnp.broadcast_to(x_ref[..., -1:], (B, N, pred_len))
    assert out.shape == (B, N, pred_len)
    assert jnp.allclose(out, ref), "mismatch vs reference"

    print("KERNEL_OK")
</pallas_src>

<mosaic_0001>
module attributes {stable_mosaic.version = 11 : i64} {
  func.func @_nan_scrub_kernel(%arg0: i32, %arg1: memref<1x16xf32, #tpu.memory_space<vmem>>, %arg2: memref<1x16xf32, #tpu.memory_space<vmem>>) attributes {dimension_semantics = [#tpu.dimension_semantics<parallel>], iteration_bounds = array<i64: 1>, scalar_prefetch = 0 : i64, scratch_operands = 0 : i64, tpu.core_type = #tpu.core_type<tc>, window_params = [{transform_indices = @transform_0, window_bounds = array<i64: 1, 16>}, {transform_indices = @transform_1, window_bounds = array<i64: 1, 16>}]} {
    %c0 = arith.constant 0 : index
    %c0_0 = arith.constant 0 : index
    %0 = vector.load %arg1[%c0, %c0_0] : memref<1x16xf32, #tpu.memory_space<vmem>>, vector<1x16xf32>
    %1 = arith.cmpf one, %0, %0 : vector<1x16xf32>
    %cst = arith.constant 0.000000e+00 : f32
    %2 = vector.broadcast %cst : f32 to vector<1x16xf32>
    %3 = arith.select %1, %2, %0 : vector<1x16xi1>, vector<1x16xf32>
    %c0_1 = arith.constant 0 : index
    %c0_2 = arith.constant 0 : index
    %4 = vector.load %arg2[%c0_1, %c0_2] : memref<1x16xf32, #tpu.memory_space<vmem>>, vector<1x16xf32>
    tpu.vector_store %arg2[%c0_1, %c0_2], %3 {strides = array<i32>} : memref<1x16xf32, #tpu.memory_space<vmem>>, vector<1x16xf32>,
    return
  }
  func.func @transform_0(%arg0: i32) -> (i32, i32) {
    %c0_i32 = arith.constant 0 : i32
    %c0_i32_0 = arith.constant 0 : i32
    return %c0_i32, %arg0 : i32, i32
  }
  func.func @transform_1(%arg0: i32) -> (i32, i32) {
    %c0_i32 = arith.constant 0 : i32
    %c0_i32_0 = arith.constant 0 : i32
    return %c0_i32, %arg0 : i32, i32
  }
}

</mosaic_0001>

<bundles_post_ra>
// kernel: tpu_custom_call.1
= control target key start
LH: loop header
LB: loop body
LE: loop exit
PB: predicated region body
PF: predicated region fallthrough
CT: control target
= control target key end

     0   :  { %6 = vsyncpa [#allocation3], 0  ;;  %s127_s0 = inlined_call_operand.hbm [shape: f32[1,16], index: 0, kind: input, shape index: {}]   ;;  %s128_s1 = inlined_call_operand.hbm [shape: f32[1,16], index: 1, kind: output, shape index: {}]  }
   0x1   :  { %7 = vsyncpa [#allocation4], 0  ;;  %s91_s6 = smov [#allocation2]   ;;  %s43_s10 = scalar_lea.hbm %s127_s0, 16 }
   0x2   :  { %s14_s7 = sshll.u32 %s91_s6, 4  ;;  %p44_p0 = scmp.ne.s32.totalorder %s127_s0, %s43_s10  ;;  %s15_s7 = int_to_ptr.vmem [resolvable:$true] %s14_s7 }
   0x3   :  { %p47_p1 = scmp.lt.u32.totalorder %s43_s10, %s127_s0 }
   0x5   :  { %p49_p2 = pnand %p47_p1, %p44_p0 }
   0x7   :  { %52 = shalt.err (!%p49_p2)
}
   0x8   :  { %s53_s15 = scalar_lea.vmem %s15_s7, 16  ;;  %s57_s16 = scalar_lea.vmem %s15_s7, 32 }
   0x9   :  { %p54_p3 = scmp.ne.s32.totalorder %s15_s7, %s53_s15  ;;  %p58_p4 = scmp.lt.s32.totalorder %s15_s7, %s15_s7 }
   0xa   :  { %p59_p5 = scmp.lt.s32.totalorder %s57_s16, %s53_s15 }
   0xc   :  { %p60_p6 = por %p59_p5, %p58_p4 }
   0xe   :  { %p61_p7 = pnand %p60_p6, %p54_p3 }
  0x10   :  { %64 = shalt.err (!%p61_p7)
}
  0x11   :  { %17 = dma.hbm_to_vmem [thread:$0]  %s127_s0, 16, %s15_s7, [#allocation3]  }
  0x12   :  { %87 = dma.done.wait [#allocation3], 16  }
  0x13   :  { %88 = vsyncadd [#allocation3], 4294967280  ;;  %s92_s19 = smov [#allocation5]   ;;  %v21_v0 = vld [vmem:[#allocation2] sm:$0x1]  ;;  %vm24_vm0 = vcmask 122880  }
  0x14   :  { %s32_s20 = sshll.u32 %s92_s19, 4  ;;  %vm22_vm1 = vcmp.ne.f32.partialorder %v21_v0, %v21_v0  ;;  %s33_s20 = int_to_ptr.vmem [resolvable:$true] %s32_s20 }
  0x15   :  { %v23_v1 = vsel %vm22_vm1, 0.0, %v21_v0  ;;  %s65_s21 = scalar_lea.vmem %s33_s20, 16  ;;  %s69_s22 = scalar_lea.vmem %s33_s20, 32 }
  0x16   :  { %25 = vst.msk [vmem:[#allocation5] sm:$0x1] %vm24_vm0, %v23_v1  ;;  %p66_p8 = scmp.ne.s32.totalorder %s33_s20, %s65_s21  ;;  %p70_p9 = scmp.lt.s32.totalorder %s33_s20, %s33_s20 }
  0x17   :  { %p71_p10 = scmp.lt.s32.totalorder %s69_s22, %s65_s21 }
  0x19   :  { %p72_p11 = por %p71_p10, %p70_p9 }
  0x1b   :  { %p73_p12 = pnand %p72_p11, %p66_p8 }
  0x1d   :  { %76 = shalt.err (!%p73_p12)
}
  0x1e   :  { %s77_s24 = scalar_lea.hbm %s128_s1, 16 }
  0x1f   :  { %p78_p13 = scmp.ne.s32.totalorder %s128_s1, %s77_s24  ;;  %p81_p0 = scmp.lt.u32.totalorder %s77_s24, %s128_s1 }
  0x21   :  { %p83_p1 = pnand %p81_p0, %p78_p13 }
  0x23   :  { %86 = shalt.err (!%p83_p1)
}
  0x24   :  { %35 = dma.vmem_to_hbm [thread:$0]  %s33_s20, 16, %s128_s1, [#allocation4]  }
  0x25   :  { %89 = dma.done.wait [#allocation4], 16  }
  0x26   :  { %90 = vsyncadd [#allocation4], 4294967280 }
  0x27   :  { %39 = vsyncpa [#allocation3], 1 }
  0x28   :  { %40 = vsyncpa [#allocation4], 1 }

</bundles_post_ra>
